<compile_context>
chip_gen: v7x
topology: tpu7x:2x2x1
jax: 0.10.0
libtpu: 0.0.40
codegen_flags: <defaults>
</compile_context>

<pallas_src>
import math

import jax
import jax.numpy as jnp
from jax.experimental import pallas as pl
from jax.experimental.pallas import tpu as pltpu

_LANE = 128
_SUBLANE = 8
_HALF_LOG_2PI = 0.5 * math.log(2.0 * math.pi)


def _round_up(x, m):
    return ((x + m - 1) // m) * m


def _loss_math(mu1, log_sigma1, mu2, log_sigma2, y):
    """Log-space form of -log(f); identical math to the PyTorch module."""
    mu = mu1 + mu2
    # sigma_sqr = exp(log_sigma1)**2 + exp(log_sigma2)**2 == exp(2*ls1) + exp(2*ls2)
    sigma_sqr = jnp.exp(2.0 * log_sigma1) + jnp.exp(2.0 * log_sigma2)
    log_y = jnp.log(y)
    d = log_y - mu
    return _HALF_LOG_2PI + 0.5 * jnp.log(sigma_sqr) + log_y + 0.5 * (d * d) / sigma_sqr


def _dist_loss_kernel(preds_ref, truth_ref, out_ref):
    # preds_ref: (4, block_r, 128) -- leading axis is [mu1, log_sigma1, mu2, log_sigma2]
    # truth_ref: (block_r, 128)
    # out_ref:   (block_r, 128)
    out_ref[...] = _loss_math(
        preds_ref[0], preds_ref[1], preds_ref[2], preds_ref[3], truth_ref[...]
    )


def distribution_loss(preds, truth, *, block_rows=1024, small_batch_threshold=16384):
    """preds: (B, 4) float; truth: (B, 1) or (B,) float -> loss: (B,) float32."""
    preds = jnp.asarray(preds, jnp.float32)
    truth = jnp.asarray(truth, jnp.float32)
    B = preds.shape[0]
    assert preds.shape == (B, 4)
    truth = truth.reshape(B)

    # Small-batch fast path: a single XLA elementwise fusion beats the pallas_call
    # launch + relayout for tiny batches.
    if B < small_batch_threshold:
        return _loss_math(preds[:, 0], preds[:, 1], preds[:, 2], preds[:, 3], truth)

    # --- Grid / tile sizing ------------------------------------------------
    # Lane-dense tiling of the batch: B -> (rows, 128) sublane x lane layout.
    block_rows = max(_SUBLANE, min(block_rows, 1024))  # keep v5e scoped-VMEM safe
    rows_needed = max(1, pl.cdiv(B, _LANE))

    n_steps = pl.cdiv(rows_needed, block_rows)
    # v7x has 2 TensorCores: when there is enough work, use >= 2 (and even) steps
    # so the "parallel" axis can be sharded across both cores.
    if rows_needed >= 2 * _SUBLANE:
        if n_steps < 2:
            n_steps = 2
        elif n_steps % 2:
            n_steps += 1
    block_r = _round_up(pl.cdiv(rows_needed, n_steps), _SUBLANE)
    rows = n_steps * block_r
    bp = rows * _LANE

    # --- Wrapper relayout (single fused pad + transpose expression) --------
    # Pad preds with zeros (sigma_sqr = 2 > 0) and truth with ones (log(1) = 0),
    # so padded lanes never produce NaN/inf.
    preds_t = jnp.pad(preds, ((0, bp - B), (0, 0))).T.reshape(4, rows, _LANE)
    truth_t = jnp.pad(truth, (0, bp - B), constant_values=1.0).reshape(rows, _LANE)

    out = pl.pallas_call(
        _dist_loss_kernel,
        out_shape=jax.ShapeDtypeStruct((rows, _LANE), jnp.float32),
        grid_spec=pltpu.PrefetchScalarGridSpec(
            num_scalar_prefetch=0,
            grid=(n_steps,),
            in_specs=[
                pl.BlockSpec((4, block_r, _LANE), lambda i: (0, i, 0)),
                pl.BlockSpec((block_r, _LANE), lambda i: (i, 0)),
            ],
            out_specs=pl.BlockSpec((block_r, _LANE), lambda i: (i, 0)),
        ),
        compiler_params=pltpu.CompilerParams(
            dimension_semantics=("parallel",),
            allow_input_fusion=[True, True],
        ),
        cost_estimate=pl.CostEstimate(
            flops=12 * bp,
            transcendentals=4 * bp,
            bytes_accessed=24 * bp,
        ),
    )(preds_t, truth_t)

    # PyTorch module returns shape (batchsize,)
    return out.reshape(bp)[:B]


if __name__ == "__main__":

    def reference(preds, truth):
        # plain-JAX reference, "as written" in the torch module
        mu1, ls1, mu2, ls2 = preds[:, 0], preds[:, 1], preds[:, 2], preds[:, 3]
        y = truth.reshape(-1)
        sigma_sqr = jnp.exp(ls1) ** 2 + jnp.exp(ls2) ** 2
        mu = mu1 + mu2
        f = (
            (2.0 * math.pi) ** (-0.5)
            / (jnp.sqrt(sigma_sqr) * y)
            * jnp.exp(-((jnp.log(y) - mu) ** 2) / (2.0 * sigma_sqr))
        )
        return -jnp.log(f)

    key = jax.random.PRNGKey(0)
    for B in (8, 300):  # small batch + a non-multiple-of-128 batch (exercises padding)
        key, k1, k2 = jax.random.split(key, 3)
        preds = jax.random.normal(k1, (B, 4), dtype=jnp.float32) * 0.5
        # ground-truth GW depth must be positive (log(y) in the loss)
        truth = jax.random.uniform(
            k2, (B, 1), dtype=jnp.float32, minval=0.5, maxval=3.0
        )

        # Force the Pallas path (threshold=0) so the kernel itself is exercised
        # even at these small test shapes.
        loss = distribution_loss(preds, truth, small_batch_threshold=0)
        jax.block_until_ready(loss)

        ref = reference(preds, truth)
        assert loss.shape == (B,), (loss.shape, B)
        assert jnp.allclose(loss, ref, atol=1e-5, rtol=1e-4), (B, loss, ref)

        # Also check the default small-batch fast path agrees.
        loss_fast = distribution_loss(preds, truth)
        jax.block_until_ready(loss_fast)
        assert jnp.allclose(loss_fast, ref, atol=1e-5, rtol=1e-4), (B, loss_fast, ref)

    print("KERNEL_OK")
</pallas_src>

<mosaic_0001>
module attributes {stable_mosaic.version = 11 : i64} {
  func.func @_dist_loss_kernel(%arg0: i32, %arg1: memref<4x8x128xf32, #tpu.memory_space<vmem>>, %arg2: memref<8x128xf32, #tpu.memory_space<vmem>>, %arg3: memref<8x128xf32, #tpu.memory_space<vmem>>) attributes {dimension_semantics = [#tpu.dimension_semantics<parallel>], iteration_bounds = array<i64: 1>, scalar_prefetch = 0 : i64, scratch_operands = 0 : i64, tpu.core_type = #tpu.core_type<tc>, window_params = [{transform_indices = @transform_0, window_bounds = array<i64: 4, 8, 128>}, {transform_indices = @transform_1, window_bounds = array<i64: 8, 128>}, {transform_indices = @transform_2, window_bounds = array<i64: 8, 128>}]} {
    %c0 = arith.constant 0 : index
    %c0_0 = arith.constant 0 : index
    %c0_1 = arith.constant 0 : index
    %0 = vector.load %arg1[%c0, %c0_0, %c0_1] : memref<4x8x128xf32, #tpu.memory_space<vmem>>, vector<1x8x128xf32>
    %1 = vector.shape_cast %0 : vector<1x8x128xf32> to vector<8x128xf32>
    %c1 = arith.constant 1 : index
    %c0_2 = arith.constant 0 : index
    %c0_3 = arith.constant 0 : index
    %2 = vector.load %arg1[%c1, %c0_2, %c0_3] : memref<4x8x128xf32, #tpu.memory_space<vmem>>, vector<1x8x128xf32>
    %3 = vector.shape_cast %2 : vector<1x8x128xf32> to vector<8x128xf32>
    %c2 = arith.constant 2 : index
    %c0_4 = arith.constant 0 : index
    %c0_5 = arith.constant 0 : index
    %4 = vector.load %arg1[%c2, %c0_4, %c0_5] : memref<4x8x128xf32, #tpu.memory_space<vmem>>, vector<1x8x128xf32>
    %5 = vector.shape_cast %4 : vector<1x8x128xf32> to vector<8x128xf32>
    %c3 = arith.constant 3 : index
    %c0_6 = arith.constant 0 : index
    %c0_7 = arith.constant 0 : index
    %6 = vector.load %arg1[%c3, %c0_6, %c0_7] : memref<4x8x128xf32, #tpu.memory_space<vmem>>, vector<1x8x128xf32>
    %7 = vector.shape_cast %6 : vector<1x8x128xf32> to vector<8x128xf32>
    %c0_8 = arith.constant 0 : index
    %c0_9 = arith.constant 0 : index
    %8 = vector.load %arg2[%c0_8, %c0_9] : memref<8x128xf32, #tpu.memory_space<vmem>>, vector<8x128xf32>
    %9 = arith.addf %1, %5 : vector<8x128xf32>
    %cst = arith.constant 2.000000e+00 : f32
    %10 = vector.broadcast %cst : f32 to vector<8x128xf32>
    %11 = arith.mulf %10, %3 : vector<8x128xf32>
    %12 = math.exp %11 : vector<8x128xf32>
    %cst_10 = arith.constant 2.000000e+00 : f32
    %13 = vector.broadcast %cst_10 : f32 to vector<8x128xf32>
    %14 = arith.mulf %13, %7 : vector<8x128xf32>
    %15 = math.exp %14 : vector<8x128xf32>
    %16 = arith.addf %12, %15 : vector<8x128xf32>
    %17 = math.log %8 : vector<8x128xf32>
    %18 = arith.subf %17, %9 : vector<8x128xf32>
    %19 = math.log %16 : vector<8x128xf32>
    %cst_11 = arith.constant 5.000000e-01 : f32
    %20 = vector.broadcast %cst_11 : f32 to vector<8x128xf32>
    %21 = arith.mulf %20, %19 : vector<8x128xf32>
    %cst_12 = arith.constant 0.918938517 : f32
    %22 = vector.broadcast %cst_12 : f32 to vector<8x128xf32>
    %23 = arith.addf %22, %21 : vector<8x128xf32>
    %24 = arith.addf %23, %17 : vector<8x128xf32>
    %25 = arith.mulf %18, %18 : vector<8x128xf32>
    %cst_13 = arith.constant 5.000000e-01 : f32
    %26 = vector.broadcast %cst_13 : f32 to vector<8x128xf32>
    %27 = arith.mulf %26, %25 : vector<8x128xf32>
    %28 = arith.divf %27, %16 : vector<8x128xf32>
    %29 = arith.addf %24, %28 : vector<8x128xf32>
    %c0_14 = arith.constant 0 : index
    %c0_15 = arith.constant 0 : index
    %30 = vector.load %arg3[%c0_14, %c0_15] : memref<8x128xf32, #tpu.memory_space<vmem>>, vector<8x128xf32>
    tpu.vector_store %arg3[%c0_14, %c0_15], %29 {strides = array<i32>} : memref<8x128xf32, #tpu.memory_space<vmem>>, vector<8x128xf32>,
    return
  }
  func.func @transform_0(%arg0: i32) -> (i32, i32, i32) {
    %c0_i32 = arith.constant 0 : i32
    %c0_i32_0 = arith.constant 0 : i32
    %c0_i32_1 = arith.constant 0 : i32
    return %c0_i32, %arg0, %c0_i32_0 : i32, i32, i32
  }
  func.func @transform_1(%arg0: i32) -> (i32, i32) {
    %c0_i32 = arith.constant 0 : i32
    %c0_i32_0 = arith.constant 0 : i32
    return %arg0, %c0_i32 : i32, i32
  }
  func.func @transform_2(%arg0: i32) -> (i32, i32) {
    %c0_i32 = arith.constant 0 : i32
    %c0_i32_0 = arith.constant 0 : i32
    return %arg0, %c0_i32 : i32, i32
  }
}

</mosaic_0001>

<bundles_post_ra>
// kernel: tpu_custom_call.1
= control target key start
LH: loop header
LB: loop body
LE: loop exit
PB: predicated region body
PF: predicated region fallthrough
CT: control target
= control target key end

     0   :  { %7 = vsyncpa [#allocation3], 0  ;;  %s227_s0 = inlined_call_operand.hbm [shape: f32[4,8,128], index: 0, kind: input, shape index: {}]   ;;  %s228_s1 = inlined_call_operand.hbm [shape: f32[8,128], index: 1, kind: input, shape index: {}]   ;;  %s229_s2 = inlined_call_operand.hbm [shape: f32[8,128], index: 2, kind: output, shape index: {}]  }
   0x1   :  { %8 = vsyncpa [#allocation6], 0 }
   0x2   :  { %9 = vsyncpa [#allocation4], 0  ;;  %s171_s9 = smov [#allocation2]   ;;  %s99_s13 = scalar_lea.hbm %s227_s0, 512 }
   0x3   :  { %s15_s10 = sshll.u32 %s171_s9, 4  ;;  %p100_p0 = scmp.ne.s32.totalorder %s227_s0, %s99_s13  ;;  %s16_s10 = int_to_ptr.vmem [resolvable:$true] %s15_s10 }
   0x4   :  { %p103_p1 = scmp.lt.u32.totalorder %s99_s13, %s227_s0 }
   0x6   :  { %p105_p2 = pnand %p103_p1, %p100_p0 }
   0x8   :  { %108 = shalt.err (!%p105_p2)
}
   0x9   :  { %s109_s18 = scalar_lea.vmem %s16_s10, 512  ;;  %p114_p4 = scmp.lt.s32.totalorder %s16_s10, %s16_s10 }
   0xa   :  { %p110_p3 = scmp.ne.s32.totalorder %s16_s10, %s109_s18  ;;  %p115_p5 = scmp.lt.s32.totalorder %s109_s18, %s109_s18 }
   0xc   :  { %p116_p6 = por %p115_p5, %p114_p4 }
   0xe   :  { %p117_p7 = pnand %p116_p6, %p110_p3 }
  0x10   :  { %120 = shalt.err (!%p117_p7)
}
  0x11   :  { %s172_s19 = smov 128   ;;  %s173_s20 = smov 8  }
  0x12   :  { %21 = dma.hbm_to_vmem [thread:$0]  %s227_s0, 512, %s16_s10, [#allocation3], %s172_s19, %s172_s19, %s173_s20  }
  0x13   :  { %s174_s23 = smov [#allocation5]   ;;  %s121_s27 = scalar_lea.hbm %s228_s1, 128 }
  0x14   :  { %s28_s24 = sshll.u32 %s174_s23, 4  ;;  %p122_p8 = scmp.ne.s32.totalorder %s228_s1, %s121_s27  ;;  %s29_s24 = int_to_ptr.vmem [resolvable:$true] %s28_s24 }
  0x15   :  { %p125_p9 = scmp.lt.u32.totalorder %s121_s27, %s228_s1 }
  0x17   :  { %p127_p10 = pnand %p125_p9, %p122_p8 }
  0x19   :  { %130 = shalt.err (!%p127_p10)
}
  0x1a   :  { %s131_s4 = scalar_lea.vmem %s29_s24, 128  ;;  %p136_p12 = scmp.lt.s32.totalorder %s29_s24, %s29_s24 }
  0x1b   :  { %p132_p11 = scmp.ne.s32.totalorder %s29_s24, %s131_s4  ;;  %p137_p13 = scmp.lt.s32.totalorder %s131_s4, %s131_s4 }
  0x1d   :  { %p138_p0 = por %p137_p13, %p136_p12 }
  0x1f   :  { %p139_p1 = pnand %p138_p0, %p132_p11 }
  0x21   :  { %142 = shalt.err (!%p139_p1)
}
  0x22   :  { %31 = dma.hbm_to_vmem [thread:$0]  %s228_s1, 128, %s29_s24, [#allocation6]  }
  0x23   :  { %165 = dma.done.wait [#allocation3], 512  }
  0x24   :  { %166 = vsyncadd [#allocation3], 4294966784 }
  0x25   :  { %167 = dma.done.wait [#allocation6], 128  }
  0x26   :  { %168 = vsyncadd [#allocation6], 4294967168  ;;  %v40_v0 = vld [vmem:[#allocation2 + $0x8] sm:$0xff]  ;;  %v44_v1 = vld [vmem:[#allocation2 + $0x18] sm:$0xff]  ;;  %s175_s1 = smov [#allocation7]  }
  0x27   :  { %v45_v2 = vld [vmem:[#allocation5] sm:$0xff]  ;;  %v47_v3 = vmul.f32 2.0, %v40_v0  ;;  %v50_v4 = vmul.f32 2.0, %v44_v1  ;;  %v42_v10 = vld [vmem:[#allocation2 + $0x10] sm:$0xff]  ;;  %s74_s6 = sshll.u32 %s175_s1, 4  ;;  %s75_s6 = int_to_ptr.vmem [resolvable:$true] %s74_s6 }
  0x28   :  { %89 = vlog2.f32 %v45_v2  ;;  %v38_v9 = vld [vmem:[#allocation2] sm:$0xff]  ;;  %s143_s7 = scalar_lea.vmem %s75_s6, 128  ;;  %p148_p3 = scmp.lt.s32.totalorder %s75_s6, %s75_s6 }
  0x29   :  { %v48_v5 = vmul.f32 1.442695, %v47_v3  ;;  %v51_v6 = vmul.f32 1.442695, %v50_v4  ;;  %v46_v13 = vadd.f32 %v42_v10, %v38_v9  ;;  %p144_p2 = scmp.ne.s32.totalorder %s75_s6, %s143_s7  ;;  %p149_p4 = scmp.lt.s32.totalorder %s143_s7, %s143_s7 }
  0x2b   :  { %91 = vpow2.f32 %v48_v5  ;;  %p150_p5 = por %p149_p4, %p148_p3 }
  0x2c   :  { %93 = vpow2.f32 %v51_v6 }
  0x2d   :  { %p151_p6 = pnand %p150_p5, %p144_p2 }
  0x32   :  { %v90_v7 = vpop.eup %89 }
  0x33   :  { %v55_v14 = vmul.f32 0.6931472, %v90_v7 }
  0x35   :  { %v92_v8 = vpop.eup %91  ;;  %v56_v15 = vsub.f32 %v55_v14, %v46_v13 }
  0x36   :  { %v94_v11 = vpop.eup %93 }
  0x37   :  { %v53_v12 = vadd.f32 %v94_v11, %v92_v8  ;;  %v62_v16 = vmul.f32 %v56_v15, %v56_v15 }
  0x39   :  { %95 = vlog2.f32 %v53_v12  ;;  %v63_v19 = vmul.f32 0.5, %v62_v16 }
  0x3a   :  { %97 = vrcp.f32 %v53_v12 }
  0x43   :  { %v96_v17 = vpop.eup %95 }
  0x44   :  { %v58_v18 = vmul.f32 0.6931472, %v96_v17  ;;  %v98_v20 = vpop.eup %97 }
  0x45   :  { %v65_v23 = vmul.f32 %v98_v20, %v63_v19 }
  0x46   :  { %v59_v21 = vmul.f32 0.5, %v58_v18 }
  0x48   :  { %v60_v22 = vadd.f32 0.9189385, %v59_v21 }
  0x4a   :  { %v61_v24 = vadd.f32 %v60_v22, %v55_v14 }
  0x4c   :  { %v66_v25 = vadd.f32 %v65_v23, %v61_v24 }
  0x4e   :  { %67 = vst [vmem:[#allocation7] sm:$0xff] %v66_v25 }
  0x4f   :  { %154 = shalt.err (!%p151_p6)
}
  0x50   :  { %s155_s10 = scalar_lea.hbm %s229_s2, 128 }
  0x51   :  { %p156_p7 = scmp.ne.s32.totalorder %s229_s2, %s155_s10  ;;  %p159_p8 = scmp.lt.u32.totalorder %s155_s10, %s229_s2 }
  0x53   :  { %p161_p9 = pnand %p159_p8, %p156_p7 }
  0x55   :  { %164 = shalt.err (!%p161_p9)
}
  0x56   :  { %77 = dma.vmem_to_hbm [thread:$0]  %s75_s6, 128, %s229_s2, [#allocation4]  }
  0x57   :  { %169 = dma.done.wait [#allocation4], 128  }
  0x58   :  { %170 = vsyncadd [#allocation4], 4294967168 }
  0x59   :  { %81 = vsyncpa [#allocation3], 1 }
  0x5a   :  { %82 = vsyncpa [#allocation6], 1 }
  0x5b   :  { %83 = vsyncpa [#allocation4], 1 }

</bundles_post_ra>
